<compile_context>
chip_gen: v5e
topology: v5e:2x2
jax: 0.10.0
libtpu: 0.0.40
codegen_flags: <defaults>
</compile_context>

<pallas_src>
import math

import jax
import jax.numpy as jnp
from jax import lax
from jax.experimental import pallas as pl
from jax.experimental.pallas import tpu as pltpu

PHI = (1.0 + math.sqrt(5.0)) / 2.0

# TODO(synk): UnityDomain enum is not provided in the module; assume 6 domains.
NUM_DOMAINS = 6
NUM_EXPERTS = 8           # len(ExpertSpecialization)
NUM_HEADS = 8
CONF_H1 = 256             # confidence MLP hidden sizes
CONF_H2 = 64
LN_EPS = 1e-5

# fused head layout along the 270-wide matmul output:
#   [0,256)    confidence hidden-1 pre-activation
#   [256,262)  domain logits
#   [262,270)  phi-scaled, bias-shifted expert logits
HEAD_W = CONF_H1 + NUM_DOMAINS + NUM_EXPERTS

# packed, lane-dense output slab layout (width 32, f32)
SLAB_W = 32
EXP_OFF = 0                                   # [0, 8)   expert_weights
DOM_OFF = NUM_EXPERTS                         # [8, 14)  domain_probabilities
CONF_OFF = DOM_OFF + NUM_DOMAINS              # [14, 15) routing_confidence
SLAB_USED = CONF_OFF + 1                      # 15


def _round_up(n, m):
    return ((n + m - 1) // m) * m


def _choose_tile_b(B, max_tile=1024):
    """Divisor-balanced batch tiling.

    - pads at most ~one row-tile (no 2x blowup for e.g. B=520)
    - >= 2 grid steps whenever B allows, so "parallel" semantics can shard
      across v7x's two TensorCores
    - tile capped at 1024 rows (keeps footprint well inside v7x's 64 MiB VMEM)
    """
    Bp8 = _round_up(max(B, 1), 8)
    n = max(pl.cdiv(Bp8, max_tile), 1)
    if Bp8 >= 16:
        n = max(n, 2)
    tile_b = _round_up(pl.cdiv(Bp8, n), 8)
    Bp = _round_up(Bp8, tile_b)
    return tile_b, Bp


# --------------------------------------------------------------------------
# Kernel
# --------------------------------------------------------------------------
def unity_router_kernel(
    # inputs
    x_ref,
    w1_ref, b1_ref, w2_ref, evec_ref,     # evec: rows = [b2 | ln_gamma | ln_beta]
    wh_ref, bh_ref,                        # fused head (E, 270) / (1, 270)
    wc2_ref, cvec_ref,                     # cvec: rows = [bc2 | wc3_row]
    bc3_ref,                               # SMEM scalar
    # outputs
    analyzed_ref, slab_ref,
):
    x = x_ref[...]
    tb = x.shape[0]

    # ---------------- proof_analyzer ----------------
    # Linear(E,2E) -> ReLU -> Dropout(identity) -> Linear(2E,E) -> LayerNorm
    h = jnp.dot(x.astype(jnp.bfloat16), w1_ref[...],
                preferred_element_type=jnp.float32) + b1_ref[...]
    h = jnp.maximum(h, 0.0)
    a = jnp.dot(h.astype(jnp.bfloat16), w2_ref[...],
                preferred_element_type=jnp.float32) + evec_ref[0:1, :]
    mu = jnp.mean(a, axis=-1, keepdims=True)
    d = a - mu
    var = jnp.mean(d * d, axis=-1, keepdims=True)
    analyzed = d * lax.rsqrt(var + LN_EPS) * evec_ref[1:2, :] + evec_ref[2:3, :]
    analyzed_ref[...] = analyzed.astype(analyzed_ref.dtype)

    # ------- single fused head matmul --------------------------------------
    # routed = analyzed @ (Wv@Wo) + bvo is linear, so it is folded into the
    # head weights at pack time; one MXU pass produces confidence hidden-1,
    # domain logits and (phi-scaled, consciousness-biased) expert logits.
    r = jnp.dot(analyzed.astype(jnp.bfloat16), wh_ref[...],
                preferred_element_type=jnp.float32) + bh_ref[...]
    c1 = jnp.maximum(r[:, :CONF_H1], 0.0)                          # (tb, 256)
    dl = r[:, CONF_H1:CONF_H1 + NUM_DOMAINS]                       # (tb, 6)
    sl = r[:, CONF_H1 + NUM_DOMAINS:HEAD_W]                        # (tb, 8)

    # exact, numerically-stable softmaxes (probabilities sum to 1 in f32)
    dl = dl - jnp.max(dl, axis=-1, keepdims=True)
    de = jnp.exp(dl)
    domain_p = de / jnp.sum(de, axis=-1, keepdims=True)

    sl = sl - jnp.max(sl, axis=-1, keepdims=True)
    se = jnp.exp(sl)
    expert_w = se / jnp.sum(se, axis=-1, keepdims=True)

    # ---------------- confidence estimator tail: 256 -> 64 -> 1 -> sigmoid --
    c2 = jnp.dot(c1.astype(jnp.bfloat16), wc2_ref[...],
                 preferred_element_type=jnp.float32) + cvec_ref[0:1, :]
    c2 = jnp.maximum(c2, 0.0)
    # 64 -> 1 as VPU broadcast-multiply + lane reduction (no N=1 MXU pass)
    logit = jnp.sum(c2 * cvec_ref[1:2, :], axis=-1, keepdims=True) + bc3_ref[0, 0]
    conf = 1.0 / (1.0 + jnp.exp(-logit))

    # ---------------- packed lane-dense output slab: ONE store --------------
    pad = jnp.zeros((tb, SLAB_W - SLAB_USED), jnp.float32)
    slab = jnp.concatenate([expert_w, domain_p, conf, pad], axis=-1)
    slab_ref[...] = slab.astype(slab_ref.dtype)


# --------------------------------------------------------------------------
# Parameters
# --------------------------------------------------------------------------
def make_params(key, embed_dim):
    """Deterministic synthetic parameters (torch-module shapes, [in,out] layout)."""
    ks = jax.random.split(key, 32)
    n = iter(range(32))
    s = 0.05

    def lin(k_w, in_f, out_f):
        w = jax.random.normal(ks[k_w], (in_f, out_f), jnp.float32) * s
        b = jnp.zeros((1, out_f), jnp.float32)
        return w, b

    p = {}
    p["w1"], p["b1"] = lin(next(n), embed_dim, 2 * embed_dim)
    p["w2"], p["b2"] = lin(next(n), 2 * embed_dim, embed_dim)
    p["ln_g"] = jnp.ones((1, embed_dim), jnp.float32)
    p["ln_b"] = jnp.zeros((1, embed_dim), jnp.float32)
    p["wd"], p["bd"] = lin(next(n), embed_dim, NUM_DOMAINS)
    # q/k projections of PhiHarmonicAttention are dead at inference with
    # seq_len == 1 (softmax over a single key); kept for parameter parity only.
    p["wq"], p["bq"] = lin(next(n), embed_dim, embed_dim)
    p["wk"], p["bk"] = lin(next(n), embed_dim, embed_dim)
    p["wv"], p["bv"] = lin(next(n), embed_dim, embed_dim)
    p["wo"], p["bo"] = lin(next(n), embed_dim, embed_dim)
    p["we"], p["be"] = lin(next(n), embed_dim, NUM_EXPERTS)
    p["phi"] = jnp.full((1, 1), PHI, jnp.float32)                # phi_routing_strength
    p["cbias"] = jnp.zeros((1, NUM_EXPERTS), jnp.float32)        # consciousness_routing_bias
    p["wc1"], p["bc1"] = lin(next(n), embed_dim, CONF_H1)
    p["wc2"], p["bc2"] = lin(next(n), CONF_H1, CONF_H2)
    p["wc3"], p["bc3"] = lin(next(n), CONF_H2, 1)
    return p


def pack_params(p):
    """One-time packing (all folding in f32, single bf16 cast at the end):
    - Wv@Wo folded (attention weight == 1 with seq_len == 1)
    - the linear `routed` projection folded into the domain / expert /
      confidence-hidden heads -> one (E, 270) fused head matrix
    - phi_routing_strength and consciousness bias folded into the expert head
    - 1-row bias / LN vectors packed into two small arrays; bc3 kept scalar
    """
    bf16, f32 = jnp.bfloat16, jnp.float32
    wvo = p["wv"] @ p["wo"]                       # (E, E)
    bvo = p["bv"] @ p["wo"] + p["bo"]             # (1, E)
    phi = p["phi"][0, 0]

    wh = jnp.concatenate(
        [wvo @ p["wc1"], p["wd"], (wvo @ p["we"]) * phi], axis=1)          # (E, 270)
    bh = jnp.concatenate(
        [bvo @ p["wc1"] + p["bc1"],
         p["bd"],
         (bvo @ p["we"] + p["be"]) * phi + p["cbias"]], axis=1)            # (1, 270)

    evec = jnp.concatenate([p["b2"], p["ln_g"], p["ln_b"]], axis=0)        # (3, E)
    cvec = jnp.concatenate([p["bc2"], p["wc3"].T], axis=0)                 # (2, 64)

    return {
        "w1": p["w1"].astype(bf16), "b1": p["b1"].astype(f32),
        "w2": p["w2"].astype(bf16), "evec": evec.astype(f32),
        "wh": wh.astype(bf16), "bh": bh.astype(f32),
        "wc2": p["wc2"].astype(bf16), "cvec": cvec.astype(f32),
        "bc3": p["bc3"].reshape(1, 1).astype(f32),
    }


# --------------------------------------------------------------------------
# Wrapper
# --------------------------------------------------------------------------
@jax.jit
def unity_router_forward(proof_embedding, consciousness_levels, packed):
    # NOTE: with seq_len == 1 attention the consciousness logit bias has no
    # effect on any output (softmax over one key == 1); the argument is kept
    # for API parity with the torch module.
    del consciousness_levels

    B, E = proof_embedding.shape
    # consume x in the caller's dtype (no forced f32 round trip); the kernel
    # casts to bf16 for the MXU anyway.
    x = proof_embedding

    tile_b, Bp = _choose_tile_b(B)
    if Bp != B:
        x = jnp.pad(x, ((0, Bp - B), (0, 0)))
    grid = (Bp // tile_b,)

    def row_spec(width):
        return pl.BlockSpec((tile_b, width), lambda i: (i, 0))

    def const_spec(arr):
        r, c = arr.shape
        # resident across the grid (same block every step)
        return pl.BlockSpec((r, c), lambda i: (0, 0))

    in_specs = [
        row_spec(E),
        const_spec(packed["w1"]), const_spec(packed["b1"]),
        const_spec(packed["w2"]), const_spec(packed["evec"]),
        const_spec(packed["wh"]), const_spec(packed["bh"]),
        const_spec(packed["wc2"]), const_spec(packed["cvec"]),
        pl.BlockSpec(memory_space=pltpu.MemorySpace.SMEM),     # bc3 scalar
    ]
    out_specs = [row_spec(E), row_spec(SLAB_W)]
    out_shapes = (
        jax.ShapeDtypeStruct((Bp, E), jnp.float32),            # analyzed_features
        jax.ShapeDtypeStruct((Bp, SLAB_W), jnp.float32),       # packed narrow outputs
    )

    analyzed, slab = pl.pallas_call(
        unity_router_kernel,
        out_shape=out_shapes,
        grid_spec=pltpu.PrefetchScalarGridSpec(
            num_scalar_prefetch=0,
            grid=grid,
            in_specs=in_specs,
            out_specs=out_specs,
        ),
        compiler_params=pltpu.CompilerParams(
            dimension_semantics=("parallel",),
            # conservative: v7x has 64 MiB VMEM per TensorCore
            vmem_limit_bytes=32 * 1024 * 1024,
        ),
    )(x,
      packed["w1"], packed["b1"], packed["w2"], packed["evec"],
      packed["wh"], packed["bh"], packed["wc2"], packed["cvec"],
      packed["bc3"])

    expert_w = slab[:B, EXP_OFF:EXP_OFF + NUM_EXPERTS]
    domain_p = slab[:B, DOM_OFF:DOM_OFF + NUM_DOMAINS]
    conf = slab[:B, CONF_OFF:CONF_OFF + 1]
    # attention over the single key position is identically 1.0 -> constant
    attn = jnp.ones((B, NUM_HEADS, 1, 1), jnp.float32)

    return {
        "expert_weights": expert_w,
        "domain_probabilities": domain_p,
        "routing_confidence": conf,
        "routing_attention": attn,            # torch MHA-style [B, H, 1, 1]
        "analyzed_features": analyzed[:B],
    }


# --------------------------------------------------------------------------
# Pure-JAX reference (f32, unpacked params) for correctness checking
# --------------------------------------------------------------------------
def unity_router_reference(x, p):
    h = jnp.maximum(x @ p["w1"] + p["b1"], 0.0)
    a = h @ p["w2"] + p["b2"]
    mu = jnp.mean(a, -1, keepdims=True)
    var = jnp.mean((a - mu) ** 2, -1, keepdims=True)
    analyzed = (a - mu) / jnp.sqrt(var + LN_EPS) * p["ln_g"] + p["ln_b"]
    domain_p = jax.nn.softmax(analyzed @ p["wd"] + p["bd"], axis=-1)
    v = analyzed @ p["wv"] + p["bv"]
    routed = v @ p["wo"] + p["bo"]                 # attn == 1 with seq_len == 1
    el = routed @ p["we"] + p["be"]
    expert_w = jax.nn.softmax(el * p["phi"][0, 0] + p["cbias"], axis=-1)
    c = jnp.maximum(routed @ p["wc1"] + p["bc1"], 0.0)
    c = jnp.maximum(c @ p["wc2"] + p["bc2"], 0.0)
    conf = jax.nn.sigmoid(c @ p["wc3"] + p["bc3"])
    return expert_w, domain_p, conf, analyzed


if __name__ == "__main__":
    key = jax.random.PRNGKey(0)
    k_x, k_c, k_p = jax.random.split(key, 3)

    batch, embed_dim = 8, 128
    proof_embedding = jax.random.normal(k_x, (batch, embed_dim), jnp.float32)
    consciousness_levels = jax.random.uniform(k_c, (batch,), jnp.float32)
    params = make_params(k_p, embed_dim)
    packed = pack_params(params)

    out = unity_router_forward(proof_embedding, consciousness_levels, packed)
    out = jax.tree_util.tree_map(jax.block_until_ready, out)

    # shape / sanity checks
    assert out["expert_weights"].shape == (batch, NUM_EXPERTS)
    assert out["domain_probabilities"].shape == (batch, NUM_DOMAINS)
    assert out["routing_confidence"].shape == (batch, 1)
    assert out["routing_attention"].shape == (batch, NUM_HEADS, 1, 1)
    assert out["analyzed_features"].shape == (batch, embed_dim)
    for v in out.values():
        assert bool(jnp.all(jnp.isfinite(v)))
    assert bool(jnp.allclose(jnp.sum(out["expert_weights"], axis=-1), 1.0, atol=2e-3))
    assert bool(jnp.allclose(jnp.sum(out["domain_probabilities"], axis=-1), 1.0, atol=2e-3))
    assert bool(jnp.allclose(out["routing_attention"], 1.0, atol=1e-6))

    # loose numerical check vs f32 reference (kernel matmuls run in bf16)
    r_ew, r_dp, r_cf, r_an = unity_router_reference(proof_embedding, params)
    assert bool(jnp.max(jnp.abs(out["expert_weights"] - r_ew)) < 0.1)
    assert bool(jnp.max(jnp.abs(out["domain_probabilities"] - r_dp)) < 0.1)
    assert bool(jnp.max(jnp.abs(out["routing_confidence"] - r_cf)) < 0.1)
    assert bool(jnp.max(jnp.abs(out["analyzed_features"] - r_an)) < 0.1)

    print("KERNEL_OK")
</pallas_src>

<mosaic_0001>
module attributes {stable_mosaic.version = 11 : i64} {
  func.func @unity_router_kernel(%arg0: i32, %arg1: memref<8x128xf32, #tpu.memory_space<vmem>>, %arg2: memref<128x256xbf16, #tpu.memory_space<vmem>>, %arg3: memref<1x256xf32, #tpu.memory_space<vmem>>, %arg4: memref<256x128xbf16, #tpu.memory_space<vmem>>, %arg5: memref<3x128xf32, #tpu.memory_space<vmem>>, %arg6: memref<128x270xbf16, #tpu.memory_space<vmem>>, %arg7: memref<1x270xf32, #tpu.memory_space<vmem>>, %arg8: memref<256x64xbf16, #tpu.memory_space<vmem>>, %arg9: memref<2x64xf32, #tpu.memory_space<vmem>>, %arg10: memref<1x1xf32, #tpu.memory_space<smem>>, %arg11: memref<8x128xf32, #tpu.memory_space<vmem>>, %arg12: memref<8x32xf32, #tpu.memory_space<vmem>>) attributes {dimension_semantics = [#tpu.dimension_semantics<parallel>], iteration_bounds = array<i64: 1>, scalar_prefetch = 0 : i64, scratch_operands = 0 : i64, tpu.core_type = #tpu.core_type<tc>, window_params = [{transform_indices = @transform_0, window_bounds = array<i64: 8, 128>}, {pipeline_mode = #tpu.pipeline_mode<synchronous>, transform_indices = @transform_1, window_bounds = array<i64: 128, 256>}, {pipeline_mode = #tpu.pipeline_mode<synchronous>, transform_indices = @transform_2, window_bounds = array<i64: 1, 256>}, {pipeline_mode = #tpu.pipeline_mode<synchronous>, transform_indices = @transform_3, window_bounds = array<i64: 256, 128>}, {pipeline_mode = #tpu.pipeline_mode<synchronous>, transform_indices = @transform_4, window_bounds = array<i64: 3, 128>}, {pipeline_mode = #tpu.pipeline_mode<synchronous>, transform_indices = @transform_5, window_bounds = array<i64: 128, 270>}, {pipeline_mode = #tpu.pipeline_mode<synchronous>, transform_indices = @transform_6, window_bounds = array<i64: 1, 270>}, {pipeline_mode = #tpu.pipeline_mode<synchronous>, transform_indices = @transform_7, window_bounds = array<i64: 256, 64>}, {pipeline_mode = #tpu.pipeline_mode<synchronous>, transform_indices = @transform_8, window_bounds = array<i64: 2, 64>}, {transform_indices = @transform_9, window_bounds = array<i64: 1, 1>}, {transform_indices = @transform_10, window_bounds = array<i64: 8, 128>}, {transform_indices = @transform_11, window_bounds = array<i64: 8, 32>}]} {
    %c0 = arith.constant 0 : index
    %c0_0 = arith.constant 0 : index
    %0 = vector.load %arg1[%c0, %c0_0] : memref<8x128xf32, #tpu.memory_space<vmem>>, vector<8x128xf32>
    %1 = arith.truncf %0 : vector<8x128xf32> to vector<8x128xbf16>
    %c0_1 = arith.constant 0 : index
    %c0_2 = arith.constant 0 : index
    %2 = vector.load %arg2[%c0_1, %c0_2] : memref<128x256xbf16, #tpu.memory_space<vmem>>, vector<128x256xbf16>
    %cst = arith.constant dense<0.000000e+00> : vector<8x256xf32>
    %3 = tpu.matmul %1, %2, %cst {dimension_numbers = #tpu.dot_dimension_numbers<[1], [0], [0], [1], [0, 0, 1, 1], [], []>} : vector<8x128xbf16>, vector<128x256xbf16>, vector<8x256xf32> -> vector<8x256xf32>
    %c0_3 = arith.constant 0 : index
    %c0_4 = arith.constant 0 : index
    %4 = vector.load %arg3[%c0_3, %c0_4] : memref<1x256xf32, #tpu.memory_space<vmem>>, vector<1x256xf32>
    %5 = vector.broadcast %4 : vector<1x256xf32> to vector<8x256xf32>
    %6 = arith.addf %3, %5 : vector<8x256xf32>
    %cst_5 = arith.constant 0.000000e+00 : f32
    %7 = vector.broadcast %cst_5 : f32 to vector<8x256xf32>
    %8 = arith.maximumf %6, %7 : vector<8x256xf32>
    %9 = arith.truncf %8 : vector<8x256xf32> to vector<8x256xbf16>
    %c0_6 = arith.constant 0 : index
    %c0_7 = arith.constant 0 : index
    %10 = vector.load %arg4[%c0_6, %c0_7] : memref<256x128xbf16, #tpu.memory_space<vmem>>, vector<256x128xbf16>
    %cst_8 = arith.constant dense<0.000000e+00> : vector<8x128xf32>
    %11 = tpu.matmul %9, %10, %cst_8 {dimension_numbers = #tpu.dot_dimension_numbers<[1], [0], [0], [1], [0, 0, 1, 1], [], []>} : vector<8x256xbf16>, vector<256x128xbf16>, vector<8x128xf32> -> vector<8x128xf32>
    %c0_9 = arith.constant 0 : index
    %c0_10 = arith.constant 0 : index
    %12 = vector.load %arg5[%c0_9, %c0_10] : memref<3x128xf32, #tpu.memory_space<vmem>>, vector<1x128xf32>
    %13 = vector.broadcast %12 : vector<1x128xf32> to vector<8x128xf32>
    %14 = arith.addf %11, %13 : vector<8x128xf32>
    %cst_11 = arith.constant dense<0.000000e+00> : vector<8xf32>
    %15 = vector.multi_reduction <add>, %14, %cst_11 [1] : vector<8x128xf32> to vector<8xf32>
    %16 = vector.shape_cast %15 : vector<8xf32> to vector<8x1xf32>
    %cst_12 = arith.constant 1.280000e+02 : f32
    %17 = vector.broadcast %cst_12 : f32 to vector<8x1xf32>
    %18 = arith.divf %16, %17 : vector<8x1xf32>
    %19 = vector.broadcast %18 : vector<8x1xf32> to vector<8x128xf32>
    %20 = arith.subf %14, %19 : vector<8x128xf32>
    %21 = arith.mulf %20, %20 : vector<8x128xf32>
    %cst_13 = arith.constant dense<0.000000e+00> : vector<8xf32>
    %22 = vector.multi_reduction <add>, %21, %cst_13 [1] : vector<8x128xf32> to vector<8xf32>
    %23 = vector.shape_cast %22 : vector<8xf32> to vector<8x1xf32>
    %cst_14 = arith.constant 1.280000e+02 : f32
    %24 = vector.broadcast %cst_14 : f32 to vector<8x1xf32>
    %25 = arith.divf %23, %24 : vector<8x1xf32>
    %cst_15 = arith.constant 9.99999974E-6 : f32
    %26 = vector.broadcast %cst_15 : f32 to vector<8x1xf32>
    %27 = arith.addf %25, %26 : vector<8x1xf32>
    %28 = math.rsqrt %27 : vector<8x1xf32>
    %29 = vector.broadcast %28 : vector<8x1xf32> to vector<8x128xf32>
    %30 = arith.mulf %20, %29 : vector<8x128xf32>
    %c1 = arith.constant 1 : index
    %c0_16 = arith.constant 0 : index
    %31 = vector.load %arg5[%c1, %c0_16] : memref<3x128xf32, #tpu.memory_space<vmem>>, vector<1x128xf32>
    %32 = vector.broadcast %31 : vector<1x128xf32> to vector<8x128xf32>
    %33 = arith.mulf %30, %32 : vector<8x128xf32>
    %c2 = arith.constant 2 : index
    %c0_17 = arith.constant 0 : index
    %34 = vector.load %arg5[%c2, %c0_17] : memref<3x128xf32, #tpu.memory_space<vmem>>, vector<1x128xf32>
    %35 = vector.broadcast %34 : vector<1x128xf32> to vector<8x128xf32>
    %36 = arith.addf %33, %35 : vector<8x128xf32>
    %c0_18 = arith.constant 0 : index
    %c0_19 = arith.constant 0 : index
    %37 = vector.load %arg11[%c0_18, %c0_19] : memref<8x128xf32, #tpu.memory_space<vmem>>, vector<8x128xf32>
    tpu.vector_store %arg11[%c0_18, %c0_19], %36 {strides = array<i32>} : memref<8x128xf32, #tpu.memory_space<vmem>>, vector<8x128xf32>,
    %38 = arith.truncf %36 : vector<8x128xf32> to vector<8x128xbf16>
    %c0_20 = arith.constant 0 : index
    %c0_21 = arith.constant 0 : index
    %39 = vector.load %arg6[%c0_20, %c0_21] : memref<128x270xbf16, #tpu.memory_space<vmem>>, vector<128x270xbf16>
    %cst_22 = arith.constant dense<0.000000e+00> : vector<8x270xf32>
    %40 = tpu.matmul %38, %39, %cst_22 {dimension_numbers = #tpu.dot_dimension_numbers<[1], [0], [0], [1], [0, 0, 1, 1], [], []>} : vector<8x128xbf16>, vector<128x270xbf16>, vector<8x270xf32> -> vector<8x270xf32>
    %c0_23 = arith.constant 0 : index
    %c0_24 = arith.constant 0 : index
    %41 = vector.load %arg7[%c0_23, %c0_24] : memref<1x270xf32, #tpu.memory_space<vmem>>, vector<1x270xf32>
    %42 = vector.broadcast %41 : vector<1x270xf32> to vector<8x270xf32>
    %43 = arith.addf %40, %42 : vector<8x270xf32>
    %44 = vector.extract_strided_slice %43 {offsets = [0, 0], sizes = [8, 256], strides = [1, 1]} : vector<8x270xf32> to vector<8x256xf32>
    %cst_25 = arith.constant 0.000000e+00 : f32
    %45 = vector.broadcast %cst_25 : f32 to vector<8x256xf32>
    %46 = arith.maximumf %44, %45 : vector<8x256xf32>
    %47 = vector.extract_strided_slice %43 {offsets = [0, 256], sizes = [8, 6], strides = [1, 1]} : vector<8x270xf32> to vector<8x6xf32>
    %48 = vector.extract_strided_slice %43 {offsets = [0, 262], sizes = [8, 8], strides = [1, 1]} : vector<8x270xf32> to vector<8x8xf32>
    %cst_26 = arith.constant dense<0xFF800000> : vector<8xf32>
    %49 = vector.multi_reduction <maximumf>, %47, %cst_26 [1] : vector<8x6xf32> to vector<8xf32>
    %50 = vector.shape_cast %49 : vector<8xf32> to vector<8x1xf32>
    %51 = vector.broadcast %50 : vector<8x1xf32> to vector<8x6xf32>
    %52 = arith.subf %47, %51 : vector<8x6xf32>
    %53 = math.exp %52 : vector<8x6xf32>
    %cst_27 = arith.constant dense<0.000000e+00> : vector<8xf32>
    %54 = vector.multi_reduction <add>, %53, %cst_27 [1] : vector<8x6xf32> to vector<8xf32>
    %55 = vector.shape_cast %54 : vector<8xf32> to vector<8x1xf32>
    %56 = vector.broadcast %55 : vector<8x1xf32> to vector<8x6xf32>
    %57 = arith.divf %53, %56 : vector<8x6xf32>
    %cst_28 = arith.constant dense<0xFF800000> : vector<8xf32>
    %58 = vector.multi_reduction <maximumf>, %48, %cst_28 [1] : vector<8x8xf32> to vector<8xf32>
    %59 = vector.shape_cast %58 : vector<8xf32> to vector<8x1xf32>
    %60 = vector.broadcast %59 : vector<8x1xf32> to vector<8x8xf32>
    %61 = arith.subf %48, %60 : vector<8x8xf32>
    %62 = math.exp %61 : vector<8x8xf32>
    %cst_29 = arith.constant dense<0.000000e+00> : vector<8xf32>
    %63 = vector.multi_reduction <add>, %62, %cst_29 [1] : vector<8x8xf32> to vector<8xf32>
    %64 = vector.shape_cast %63 : vector<8xf32> to vector<8x1xf32>
    %65 = vector.broadcast %64 : vector<8x1xf32> to vector<8x8xf32>
    %66 = arith.divf %62, %65 : vector<8x8xf32>
    %67 = arith.truncf %46 : vector<8x256xf32> to vector<8x256xbf16>
    %c0_30 = arith.constant 0 : index
    %c0_31 = arith.constant 0 : index
    %68 = vector.load %arg8[%c0_30, %c0_31] : memref<256x64xbf16, #tpu.memory_space<vmem>>, vector<256x64xbf16>
    %cst_32 = arith.constant dense<0.000000e+00> : vector<8x64xf32>
    %69 = tpu.matmul %67, %68, %cst_32 {dimension_numbers = #tpu.dot_dimension_numbers<[1], [0], [0], [1], [0, 0, 1, 1], [], []>} : vector<8x256xbf16>, vector<256x64xbf16>, vector<8x64xf32> -> vector<8x64xf32>
    %c0_33 = arith.constant 0 : index
    %c0_34 = arith.constant 0 : index
    %70 = vector.load %arg9[%c0_33, %c0_34] : memref<2x64xf32, #tpu.memory_space<vmem>>, vector<1x64xf32>
    %71 = vector.broadcast %70 : vector<1x64xf32> to vector<8x64xf32>
    %72 = arith.addf %69, %71 : vector<8x64xf32>
    %cst_35 = arith.constant 0.000000e+00 : f32
    %73 = vector.broadcast %cst_35 : f32 to vector<8x64xf32>
    %74 = arith.maximumf %72, %73 : vector<8x64xf32>
    %c1_36 = arith.constant 1 : index
    %c0_37 = arith.constant 0 : index
    %75 = vector.load %arg9[%c1_36, %c0_37] : memref<2x64xf32, #tpu.memory_space<vmem>>, vector<1x64xf32>
    %76 = vector.broadcast %75 : vector<1x64xf32> to vector<8x64xf32>
    %77 = arith.mulf %74, %76 : vector<8x64xf32>
    %cst_38 = arith.constant dense<0.000000e+00> : vector<8xf32>
    %78 = vector.multi_reduction <add>, %77, %cst_38 [1] : vector<8x64xf32> to vector<8xf32>
    %79 = vector.shape_cast %78 : vector<8xf32> to vector<8x1xf32>
    %c0_39 = arith.constant 0 : index
    %c0_40 = arith.constant 0 : index
    %80 = memref.load %arg10[%c0_39, %c0_40] : memref<1x1xf32, #tpu.memory_space<smem>>
    %81 = vector.broadcast %80 : f32 to vector<8x1xf32>
    %82 = arith.addf %79, %81 : vector<8x1xf32>
    %cst_41 = arith.constant 0.000000e+00 : f32
    %83 = vector.broadcast %cst_41 : f32 to vector<8x1xf32>
    %84 = arith.subf %83, %82 : vector<8x1xf32>
    %85 = math.exp %84 : vector<8x1xf32>
    %cst_42 = arith.constant 1.000000e+00 : f32
    %86 = vector.broadcast %cst_42 : f32 to vector<8x1xf32>
    %87 = arith.addf %86, %85 : vector<8x1xf32>
    %cst_43 = arith.constant 1.000000e+00 : f32
    %88 = vector.broadcast %cst_43 : f32 to vector<8x1xf32>
    %89 = arith.divf %88, %87 : vector<8x1xf32>
    %cst_44 = arith.constant 0.000000e+00 : f32
    %90 = vector.broadcast %cst_44 : f32 to vector<8x17xf32>
    %91 = tpu.concatenate %66, %57, %89, %90 in 1 : vector<8x8xf32>, vector<8x6xf32>, vector<8x1xf32>, vector<8x17xf32> -> vector<8x32xf32>
    %c0_45 = arith.constant 0 : index
    %c0_46 = arith.constant 0 : index
    %92 = vector.load %arg12[%c0_45, %c0_46] : memref<8x32xf32, #tpu.memory_space<vmem>>, vector<8x32xf32>
    tpu.vector_store %arg12[%c0_45, %c0_46], %91 {strides = array<i32>} : memref<8x32xf32, #tpu.memory_space<vmem>>, vector<8x32xf32>,
    return
  }
  func.func @transform_0(%arg0: i32) -> (i32, i32) {
    %c0_i32 = arith.constant 0 : i32
    %c0_i32_0 = arith.constant 0 : i32
    return %arg0, %c0_i32 : i32, i32
  }
  func.func @transform_1(%arg0: i32) -> (i32, i32) {
    %c0_i32 = arith.constant 0 : i32
    %c0_i32_0 = arith.constant 0 : i32
    %c0_i32_1 = arith.constant 0 : i32
    return %c0_i32, %c0_i32_0 : i32, i32
  }
  func.func @transform_2(%arg0: i32) -> (i32, i32) {
    %c0_i32 = arith.constant 0 : i32
    %c0_i32_0 = arith.constant 0 : i32
    %c0_i32_1 = arith.constant 0 : i32
    return %c0_i32, %c0_i32_0 : i32, i32
  }
  func.func @transform_3(%arg0: i32) -> (i32, i32) {
    %c0_i32 = arith.constant 0 : i32
    %c0_i32_0 = arith.constant 0 : i32
    %c0_i32_1 = arith.constant 0 : i32
    return %c0_i32, %c0_i32_0 : i32, i32
  }
  func.func @transform_4(%arg0: i32) -> (i32, i32) {
    %c0_i32 = arith.constant 0 : i32
    %c0_i32_0 = arith.constant 0 : i32
    %c0_i32_1 = arith.constant 0 : i32
    return %c0_i32, %c0_i32_0 : i32, i32
  }
  func.func @transform_5(%arg0: i32) -> (i32, i32) {
    %c0_i32 = arith.constant 0 : i32
    %c0_i32_0 = arith.constant 0 : i32
    %c0_i32_1 = arith.constant 0 : i32
    return %c0_i32, %c0_i32_0 : i32, i32
  }
  func.func @transform_6(%arg0: i32) -> (i32, i32) {
    %c0_i32 = arith.constant 0 : i32
    %c0_i32_0 = arith.constant 0 : i32
    %c0_i32_1 = arith.constant 0 : i32
    return %c0_i32, %c0_i32_0 : i32, i32
  }
  func.func @transform_7(%arg0: i32) -> (i32, i32) {
    %c0_i32 = arith.constant 0 : i32
    %c0_i32_0 = arith.constant 0 : i32
    %c0_i32_1 = arith.constant 0 : i32
    return %c0_i32, %c0_i32_0 : i32, i32
  }
  func.func @transform_8(%arg0: i32) -> (i32, i32) {
    %c0_i32 = arith.constant 0 : i32
    %c0_i32_0 = arith.constant 0 : i32
    %c0_i32_1 = arith.constant 0 : i32
    return %c0_i32, %c0_i32_0 : i32, i32
  }
  func.func @transform_9(%arg0: i32) -> (i32, i32) {
    %c0_i32 = arith.constant 0 : i32
    %c0_i32_0 = arith.constant 0 : i32
    %c0_i32_1 = arith.constant 0 : i32
    return %c0_i32, %c0_i32_0 : i32, i32
  }
  func.func @transform_10(%arg0: i32) -> (i32, i32) {
    %c0_i32 = arith.constant 0 : i32
    %c0_i32_0 = arith.constant 0 : i32
    return %arg0, %c0_i32 : i32, i32
  }
  func.func @transform_11(%arg0: i32) -> (i32, i32) {
    %c0_i32 = arith.constant 0 : i32
    %c0_i32_0 = arith.constant 0 : i32
    return %arg0, %c0_i32 : i32, i32
  }
}

</mosaic_0001>

<bundles_post_ra>
// kernel: unity_router_forward.1
= control target key start
LH: loop header
LB: loop body
LE: loop exit
PB: predicated region body
PF: predicated region fallthrough
CT: control target
= control target key end

     0   :  { %s1714_s0 = inlined_call_operand.vmem [shape: f32[8,128], index: 0, kind: input, shape index: {}]   ;;  %s1715_s1 = inlined_call_operand.vmem [shape: bf16[128,256], index: 1, kind: input, shape index: {}]   ;;  %s1716_s2 = inlined_call_operand.vmem [shape: f32[1,256], index: 2, kind: input, shape index: {}]   ;;  %s1717_s3 = inlined_call_operand.vmem [shape: bf16[256,128], index: 3, kind: input, shape index: {}]   ;;  %s1718_s4 = inlined_call_operand.vmem [shape: f32[3,128], index: 4, kind: input, shape index: {}]   ;;  %s1719_s5 = inlined_call_operand.vmem [shape: bf16[128,270], index: 5, kind: input, shape index: {}]   ;;  %s1720_s6 = inlined_call_operand.vmem [shape: f32[1,270], index: 6, kind: input, shape index: {}]   ;;  %s1721_s7 = inlined_call_operand.vmem [shape: bf16[256,64], index: 7, kind: input, shape index: {}]   ;;  %s1722_s8 = inlined_call_operand.vmem [shape: f32[2,64], index: 8, kind: input, shape index: {}]   ;;  %s1723_s9 = inlined_call_operand.<no memory space> [shape: f32[1,1], index: 9, kind: input, shape index: {}]   ;;  %s1724_s10 = inlined_call_operand.hbm [shape: f32[8,128], index: 10, kind: output, shape index: {0}]   ;;  %s1725_s11 = inlined_call_operand.vmem [shape: f32[8,32], index: 11, kind: output, shape index: {1}]  }
   0x1   :  { %v909_v0 = vld [vmem:[%s1715_s1 + $0x70] sm:$0xf]  ;;  %v1154_v1 = vld [vmem:[%s1715_s1 + $0x74] sm:$0xf0]  ;;  %v1153_v2 = vld [vmem:[%s1715_s1 + $0x74] sm:$0xf] }
   0x2   :  { %v910_v3 = vor.u32 %v1154_v1, %v909_v0  ;;  %v911_v4 = vld [vmem:[%s1715_s1 + $0x78] sm:$0xf0]  ;;  %v901_v5 = vld [vmem:[%s1715_s1 + $0x60] sm:$0xf]  ;;  %v1152_v6 = vld [vmem:[%s1715_s1 + $0x64] sm:$0xf0] }
   0x3   :  { %v914_v7 = vor.u32 %v1153_v2, %v911_v4  ;;  %v1151_v8 = vld [vmem:[%s1715_s1 + $0x64] sm:$0xf]  ;;  %v903_v9 = vld [vmem:[%s1715_s1 + $0x68] sm:$0xf0]  ;;  %v902_v10 = vor.u32 %v1152_v6, %v901_v5  ;;  %v893_v12 = vld [vmem:[%s1715_s1 + $0x50] sm:$0xf] }
   0x4   :  { %143 = vmatpush.bf16.msra.mxu0 %v910_v3  ;;  %v906_v11 = vor.u32 %v1151_v8, %v903_v9  ;;  %v1150_v13 = vld [vmem:[%s1715_s1 + $0x54] sm:$0xf0]  ;;  %v1149_v14 = vld [vmem:[%s1715_s1 + $0x54] sm:$0xf]  ;;  %v895_v15 = vld [vmem:[%s1715_s1 + $0x58] sm:$0xf0] }
   0x5   :  { %156 = vmatpush.bf16.msra.mxu1 %v914_v7  ;;  %v894_v16 = vor.u32 %v1150_v13, %v893_v12  ;;  %v898_v17 = vor.u32 %v1149_v14, %v895_v15  ;;  %v885_v18 = vld [vmem:[%s1715_s1 + $0x40] sm:$0xf]  ;;  %v1148_v19 = vld [vmem:[%s1715_s1 + $0x44] sm:$0xf0]  ;;  %v1147_v20 = vld [vmem:[%s1715_s1 + $0x44] sm:$0xf] }
   0x6   :  { %v887_v21 = vld [vmem:[%s1715_s1 + $0x48] sm:$0xf0]  ;;  %v886_v22 = vor.u32 %v1148_v19, %v885_v18  ;;  %v1162_v23 = vld [vmem:[%s1717_s3 + $0x38] sm:$0xff]  ;;  %v877_v26 = vld [vmem:[%s1715_s1 + $0x30] sm:$0xf] }
   0x7   :  { %v1170_v24 = vld [vmem:[%s1717_s3 + $0x78] sm:$0xff]  ;;  %v890_v25 = vor.u32 %v1147_v20, %v887_v21  ;;  %v1145_v28 = vld [vmem:[%s1715_s1 + $0x34] sm:$0xf]  ;;  %303 = vmatpush.bf16.msra.mxu2 %v1162_v23  ;;  %v869_v32 = vld [vmem:[%s1715_s1 + $0x20] sm:$0xf] }
   0x8   :  { %144 = vmatpush.bf16.msra.mxu0 %v902_v10  ;;  %v1146_v27 = vld [vmem:[%s1715_s1 + $0x34] sm:$0xf0]  ;;  %v879_v29 = vld [vmem:[%s1715_s1 + $0x38] sm:$0xf0]  ;;  %316 = vmatpush.bf16.msra.mxu3 %v1170_v24  ;;  %v1161_v30 = vld [vmem:[%s1717_s3 + $0x30] sm:$0xff] }
   0x9   :  { %157 = vmatpush.bf16.msra.mxu1 %v906_v11  ;;  %v1169_v31 = vld [vmem:[%s1717_s3 + $0x70] sm:$0xff]  ;;  %v1144_v33 = vld [vmem:[%s1715_s1 + $0x24] sm:$0xf0]  ;;  %v878_v34 = vor.u32 %v1146_v27, %v877_v26  ;;  %v1143_v35 = vld [vmem:[%s1715_s1 + $0x24] sm:$0xf]  ;;  %v882_v37 = vor.u32 %v1145_v28, %v879_v29 }
   0xa   :  { %v871_v36 = vld [vmem:[%s1715_s1 + $0x28] sm:$0xf0] }
   0xb   :  { %v1160_v38 = vld [vmem:[%s1717_s3 + $0x28] sm:$0xff]  ;;  %304 = vmatpush.bf16.msra.mxu2 %v1161_v30 }
   0xc   :  { %145 = vmatpush.bf16.msra.mxu0 %v894_v16  ;;  %317 = vmatpush.bf16.msra.mxu3 %v1169_v31  ;;  %v1168_v39 = vld [vmem:[%s1717_s3 + $0x68] sm:$0xff] }
   0xd   :  { %158 = vmatpush.bf16.msra.mxu1 %v898_v17 }
  0x10   :  { %146 = vmatpush.bf16.msra.mxu0 %v886_v22 }
  0x11   :  { %159 = vmatpush.bf16.msra.mxu1 %v890_v25 }
  0x12   :  { %18 = vsyncpa [#allocation4], 0  ;;  %v870_v40 = vor.u32 %v1144_v33, %v869_v32  ;;  %v874_v41 = vor.u32 %v1143_v35, %v871_v36  ;;  %v861_v42 = vld [vmem:[%s1715_s1 + $0x10] sm:$0xf]  ;;  %v1142_v43 = vld [vmem:[%s1715_s1 + $0x14] sm:$0xf0]  ;;  %305 = vmatpush.bf16.msra.mxu2 %v1160_v38  ;;  %318 = vmatpush.bf16.msra.mxu3 %v1168_v39 }
  0x13   :  { %v1141_v44 = vld [vmem:[%s1715_s1 + $0x14] sm:$0xf]  ;;  %v863_v45 = vld [vmem:[%s1715_s1 + $0x18] sm:$0xf0]  ;;  %v1159_v46 = vld [vmem:[%s1717_s3 + $0x20] sm:$0xff]  ;;  %v862_v48 = vor.u32 %v1142_v43, %v861_v42  ;;  %v1262_v22 = vmov 128.0  }
  0x14   :  { %147 = vmatpush.bf16.msra.mxu0 %v878_v34  ;;  %v1167_v47 = vld [vmem:[%s1717_s3 + $0x60] sm:$0xff]  ;;  %v866_v49 = vor.u32 %v1141_v44, %v863_v45  ;;  %v1140_v51 = vld [vmem:[%s1715_s1 + $0x4] sm:$0xf0]  ;;  %v855_v53 = vld [vmem:[%s1715_s1 + $0x8] sm:$0xf0]  ;;  %1220 = vrcp.f32 %v1262_v22  ;;  %vm598_vm4 = vcmask 113712  }
  0x15   :  { %160 = vmatpush.bf16.msra.mxu1 %v882_v37  ;;  %v853_v50 = vld [vmem:[%s1715_s1] sm:$0xf]  ;;  %v1139_v52 = vld [vmem:[%s1715_s1 + $0x4] sm:$0xf]  ;;  %v1158_v54 = vld [vmem:[%s1717_s3 + $0x18] sm:$0xff]  ;;  %vm573_vm5 = vcmask 48128  }
  0x16   :  { %306 = vmatpush.bf16.msra.mxu2 %v1159_v46  ;;  %319 = vmatpush.bf16.msra.mxu3 %v1167_v47  ;;  %v1166_v55 = vld [vmem:[%s1717_s3 + $0x58] sm:$0xff]  ;;  %v854_v56 = vor.u32 %v1140_v51, %v853_v50  ;;  %v39_v57 = vld [vmem:[%s1714_s0] sm:$0xff]  ;;  %v858_v58 = vor.u32 %v1139_v52, %v855_v53  ;;  %v1157_v59 = vld [vmem:[%s1717_s3 + $0x10] sm:$0xff]  ;;  %s1263_s15 = smov 122   ;;  %vm790_vm6 = vcmask 523264   ;;  %vm609_vm7 = vcmask 64512  }
  0x17   :  { %v1165_v60 = vld [vmem:[%s1717_s3 + $0x50] sm:$0xff]  ;;  %v40_v61 = vpack.c.bf16 %v39_v57, %v39_v57  ;;  %v1156_v62 = vld [vmem:[%s1717_s3 + $0x8] sm:$0xff]  ;;  %v1155_v0 = vld [vmem:[%s1717_s3] sm:$0xff]  ;;  %s1265_s18 = smov [#allocation3]  }
  0x18   :  { %148 = vmatpush.bf16.msra.mxu0 %v870_v40  ;;  %v1164_v63 = vld [vmem:[%s1717_s3 + $0x48] sm:$0xff]  ;;  %v1163_v1 = vld [vmem:[%s1717_s3 + $0x40] sm:$0xff]  ;;  %v1193_v24 = vld [vmem:[%s1719_s5 + $0xb0] sm:$0xf0]  ;;  %s836_s19 = sshll.u32 %s1265_s18, 4  ;;  %s837_s19 = int_to_ptr.vmem [resolvable:$true] %s836_s19 }
  0x19   :  { %161 = vmatpush.bf16.msra.mxu1 %v874_v41  ;;  %v57_v2 = vld [vmem:[%s1716_s2] sm:$0x3]  ;;  %v1065_v23 = vld [vmem:[%s1719_s5 + $0xa8] sm:$0xf]  ;;  %v1192_v25 = vld [vmem:[%s1719_s5 + $0xac] sm:$0xf] }
  0x1a   :  { %307 = vmatpush.bf16.msra.mxu2 %v1158_v54  ;;  %320 = vmatpush.bf16.msra.mxu3 %v1166_v55  ;;  %v59_v3 = vperm.slane %v57_v2, 0  ;;  %v60_v4 = vperm.slane %v57_v2, 1  ;;  %v1215_v15 = vld [vmem:[%s1718_s4] ss:$0 sm:$0xff]  ;;  %v1066_v26 = vor.u32 %v1193_v24, %v1065_v23  ;;  %v1067_v27 = vld [vmem:[%s1719_s5 + $0xb4] sm:$0xf0]  ;;  %v1221_v32 = vpop.eup %1220 }
  0x1b   :  { %v1073_v28 = vld [vmem:[%s1719_s5 + $0xb0] sm:$0xf]  ;;  %v1194_v29 = vld [vmem:[%s1719_s5 + $0xb8] sm:$0xf0]  ;;  %v1070_v30 = vor.u32 %v1192_v25, %v1067_v27  ;;  %v332_v33 = vmul.f32 128.0, %v1221_v32  ;;  %vm336_vm0 = vweird.f32 %v1221_v32  ;;  %s838_s2 = sshll.u32 %s1724_s10, 4  ;;  %s839_s2 = int_to_ptr.hbm [resolvable:$true] %s838_s2 }
  0x1c   :  { %149 = vmatpush.bf16.msra.mxu0 %v862_v48  ;;  %v1074_v31 = vor.u32 %v1194_v29, %v1073_v28  ;;  %v1053_v42 = vld [vmem:[%s1719_s5 + $0x90] sm:$0xf]  ;;  %v1190_v43 = vld [vmem:[%s1719_s5 + $0x98] sm:$0xf0]  ;;  %v1189_v44 = vld [vmem:[%s1719_s5 + $0x94] sm:$0xf] }
  0x1d   :  { %162 = vmatpush.bf16.msra.mxu1 %v866_v49  ;;  %v333_v34 = vsub.f32 1.0, %v332_v33  ;;  %v1054_v45 = vor.u32 %v1190_v43, %v1053_v42  ;;  %v1055_v46 = vld [vmem:[%s1719_s5 + $0x9c] sm:$0xf0]  ;;  %v1061_v47 = vld [vmem:[%s1719_s5 + $0x98] sm:$0xf] }
  0x1e   :  { %308 = vmatpush.bf16.msra.mxu2 %v1157_v59  ;;  %321 = vmatpush.bf16.msra.mxu3 %v1165_v60  ;;  %v1191_v48 = vld [vmem:[%s1719_s5 + $0xa0] sm:$0xf0]  ;;  %v1058_v49 = vor.u32 %v1189_v44, %v1055_v46  ;;  %v1041_v51 = vld [vmem:[%s1719_s5 + $0x78] sm:$0xf]  ;;  %v1186_v53 = vld [vmem:[%s1719_s5 + $0x7c] sm:$0xf] }
  0x1f   :  { %v334_v35 = vmul.f32 %v1221_v32, %v333_v34  ;;  %v1062_v50 = vor.u32 %v1191_v48, %v1061_v47  ;;  %v1187_v52 = vld [vmem:[%s1719_s5 + $0x80] sm:$0xf0]  ;;  %v1043_v55 = vld [vmem:[%s1719_s5 + $0x84] sm:$0xf0]  ;;  %v1188_v57 = vld [vmem:[%s1719_s5 + $0x88] sm:$0xf0] }
  0x20   :  { %150 = vmatpush.bf16.msra.mxu0 %v854_v56  ;;  %v1042_v54 = vor.u32 %v1187_v52, %v1041_v51  ;;  %v1049_v56 = vld [vmem:[%s1719_s5 + $0x80] sm:$0xf]  ;;  %v1185_v2 = vld [vmem:[%s1719_s5 + $0x70] sm:$0xf0]  ;;  %v993_v23 = vld [vmem:[%s1719_s5 + $0x18] sm:$0xf] }
  0x21   :  { %163 = vmatpush.bf16.msra.mxu1 %v858_v58  ;;  %v335_v36 = vadd.f32 %v1221_v32, %v334_v35  ;;  %v1046_v58 = vor.u32 %v1186_v53, %v1043_v55  ;;  %v1050_v59 = vor.u32 %v1188_v57, %v1049_v56  ;;  %v1029_v60 = vld [vmem:[%s1719_s5 + $0x60] sm:$0xf]  ;;  %v1175_v24 = vld [vmem:[%s1719_s5 + $0x20] sm:$0xf0]  ;;  %v1174_v25 = vld [vmem:[%s1719_s5 + $0x1c] sm:$0xf] }
  0x22   :  { %309 = vmatpush.bf16.msra.mxu2 %v1156_v62  ;;  %322 = vmatpush.bf16.msra.mxu3 %v1164_v63  ;;  %v1183_v62 = vld [vmem:[%s1719_s5 + $0x64] sm:$0xf]  ;;  %v995_v27 = vld [vmem:[%s1719_s5 + $0x24] sm:$0xf0]  ;;  %v1001_v28 = vld [vmem:[%s1719_s5 + $0x20] sm:$0xf] }
  0x23   :  { %151 = vmatmul.bf16.vlgmr.msra.gmra.mxu0 %v40_v61  ;;  %v1497_v37 = vsel %vm336_vm0, %v1221_v32, %v335_v36  ;;  %v1176_v29 = vld [vmem:[%s1719_s5 + $0x28] sm:$0xf0]  ;;  %v981_v32 = vld [vmem:[%s1719_s5] sm:$0xf]  ;;  %v1171_v34 = vld [vmem:[%s1719_s5 + $0x4] sm:$0xf] }
  0x24   :  { %164 = vmatmul.bf16.vlgmr.msra.gmra.mxu1 %v40_v61  ;;  %532 = vmatpush.bf16.msrb.mxu0 %v1066_v26  ;;  %v1184_v61 = vld [vmem:[%s1719_s5 + $0x68] sm:$0xf0]  ;;  %v994_v26 = vor.u32 %v1175_v24, %v993_v23  ;;  %v983_v36 = vld [vmem:[%s1719_s5 + $0xc] sm:$0xf0]  ;;  %v1202_v44 = vld [vmem:[%s1721_s7 + $0x38] sm:$0xff] }
  0x25   :  { %545 = vmatpush.bf16.msrb.mxu1 %v1070_v30  ;;  %v1030_v63 = vor.u32 %v1184_v61, %v1029_v60  ;;  %v998_v30 = vor.u32 %v1174_v25, %v995_v27  ;;  %v1172_v33 = vld [vmem:[%s1719_s5 + $0x8] sm:$0xf0]  ;;  %v1201_v47 = vld [vmem:[%s1721_s7 + $0x30] sm:$0xff]  ;;  %v1199_v51 = vld [vmem:[%s1721_s7 + $0x20] sm:$0xff] }
  0x26   :  { %310 = vmatpush.bf16.msra.mxu2 %v1155_v0  ;;  %323 = vmatpush.bf16.msra.mxu3 %v1163_v1  ;;  %v1031_v0 = vld [vmem:[%s1719_s5 + $0x6c] sm:$0xf0]  ;;  %v1037_v1 = vld [vmem:[%s1719_s5 + $0x68] sm:$0xf]  ;;  %v982_v35 = vor.u32 %v1172_v33, %v981_v32  ;;  %v1207_v52 = vld [vmem:[%s1721_s7 + $0x60] sm:$0xff] }
  0x27   :  { %v1209_v48 = vld [vmem:[%s1721_s7 + $0x70] sm:$0xff]  ;;  %v1198_v56 = vld [vmem:[%s1721_s7 + $0x18] sm:$0xff]  ;;  %v1218_v32 = vld [vmem:[%s1722_s8] ss:$0 sm:$0xff] }
  0x28   :  { %533 = vmatpush.bf16.msrb.mxu0 %v1054_v45  ;;  %v1210_v45 = vld [vmem:[%s1721_s7 + $0x78] sm:$0xff]  ;;  %v1197_v60 = vld [vmem:[%s1721_s7 + $0x10] sm:$0xff] }
  0x29   :  { %546 = vmatpush.bf16.msrb.mxu1 %v1058_v49  ;;  %v1206_v57 = vld [vmem:[%s1721_s7 + $0x58] sm:$0xff]  ;;  %v1205_v61 = vld [vmem:[%s1721_s7 + $0x50] sm:$0xff] }
  0x2a   :  { %558 = vmatpush.bf16.msrb.mxu2 %v1074_v31  ;;  %v1002_v31 = vor.u32 %v1176_v29, %v1001_v28  ;;  %760 = vmatpush.bf16.msrb.mxu3 %v1202_v44 }
  0x2c   :  { %534 = vmatpush.bf16.msrb.mxu0 %v1042_v54 }
  0x2d   :  { %547 = vmatpush.bf16.msrb.mxu1 %v1046_v58 }
  0x2e   :  { %559 = vmatpush.bf16.msrb.mxu2 %v1062_v50  ;;  %761 = vmatpush.bf16.msrb.mxu3 %v1201_v47  ;;  %v1200_v50 = vld [vmem:[%s1721_s7 + $0x28] sm:$0xff] }
  0x30   :  { %535 = vmatpush.bf16.msrb.mxu0 %v1030_v63  ;;  %v1216_v63 = vld [vmem:[%s1718_s4 + $0x1] ss:$0 sm:$0xff] }
  0x32   :  { %560 = vmatpush.bf16.msrb.mxu2 %v1050_v59  ;;  %762 = vmatpush.bf16.msrb.mxu3 %v1200_v50 }
  0x36   :  { %763 = vmatpush.bf16.msrb.mxu3 %v1199_v51 }
  0x3a   :  { %764 = vmatpush.bf16.msrb.mxu3 %v1198_v56 }
  0x3e   :  { %765 = vmatpush.bf16.msrb.mxu3 %v1197_v60 }
  0xa0   :  { %v152_v5 = vpop.f32.mrf.mxu0 }
  0xa1   :  { %v153_v6 = vadd.f32 %v152_v5, %v59_v3  ;;  %v165_v7 = vpop.f32.mrf.mxu1  ;;  %v1034_v3 = vor.u32 %v1183_v62, %v1031_v0  ;;  %v1017_v5 = vld [vmem:[%s1719_s5 + $0x48] sm:$0xf] }
  0xa2   :  { %v166_v8 = vadd.f32 %v165_v7, %v60_v4  ;;  %v1038_v4 = vor.u32 %v1185_v2, %v1037_v1  ;;  %v1180_v7 = vld [vmem:[%s1719_s5 + $0x4c] sm:$0xf]  ;;  %v1217_v2 = vld [vmem:[%s1718_s4 + $0x2] ss:$0 sm:$0xff] }
  0xa3   :  { %v169_v9 = vmax.f32 %v153_v6, 0.0  ;;  %548 = vmatpush.bf16.msrb.mxu1 %v1034_v3  ;;  %v1181_v6 = vld [vmem:[%s1719_s5 + $0x50] sm:$0xf0] }
  0xa4   :  { %v170_v10 = vmax.f32 %v166_v8, 0.0  ;;  %561 = vmatpush.bf16.msrb.mxu2 %v1038_v4  ;;  %v1018_v8 = vor.u32 %v1181_v6, %v1017_v5  ;;  %v1196_v6 = vld [vmem:[%s1721_s7 + $0x8] sm:$0xff] }
  0xa5   :  { %v171_v11 = vpack.c.bf16 %v169_v9, %v169_v9  ;;  %v1019_v9 = vld [vmem:[%s1719_s5 + $0x54] sm:$0xf0]  ;;  %766 = vmatpush.bf16.msrb.mxu3 %v1196_v6 }
  0xa6   :  { %v172_v12 = vpack.c.bf16 %v170_v10, %v170_v10  ;;  %v1025_v10 = vld [vmem:[%s1719_s5 + $0x50] sm:$0xf]  ;;  %536 = vmatpush.bf16.msrb.mxu0 %v1018_v8  ;;  %v1203_v8 = vld [vmem:[%s1721_s7 + $0x40] sm:$0xff] }
  0xa7   :  { %311 = vmatmul.bf16.vlgmr.msra.gmra.mxu2 %v171_v11  ;;  %v1182_v11 = vld [vmem:[%s1719_s5 + $0x58] sm:$0xf0] }
  0xa8   :  { %324 = vmatmul.bf16.vlgmr.msra.gmra.mxu3 %v172_v12  ;;  %v154_v13 = vpop.f32.mrf.mxu0  ;;  %v1022_v12 = vor.u32 %v1180_v7, %v1019_v9  ;;  %v1204_v7 = vld [vmem:[%s1721_s7 + $0x48] sm:$0xff]  ;;  %v396_v9 = vld [vmem:[%s1720_s6] sm:$0x7] }
  0xa9   :  { %v167_v14 = vpop.f32.mrf.mxu1  ;;  %v1026_v13 = vor.u32 %v1182_v11, %v1025_v10  ;;  %v398_v10 = vperm.slane %v396_v9, 0  ;;  %v399_v11 = vperm.slane %v396_v9, 1 }
  0xaa   :  { %549 = vmatpush.bf16.msrb.mxu1 %v1022_v12  ;;  %v1005_v14 = vld [vmem:[%s1719_s5 + $0x30] sm:$0xf] }
  0xab   :  { %562 = vmatpush.bf16.msrb.mxu2 %v1026_v13 }
 0x12a   :  { %v312_v16 = vpop.f32.mrf.mxu2 }
 0x12b   :  { %v313_v17 = vadd.f32 %v1215_v15, %v312_v16  ;;  %v325_v18 = vpop.f32.mrf.mxu3  ;;  %v1178_v15 = vld [vmem:[%s1719_s5 + $0x38] sm:$0xf0]  ;;  %v1177_v16 = vld [vmem:[%s1719_s5 + $0x34] sm:$0xf] }
 0x12d   :  { %v326_v19 = vadd.f32 %v325_v18, %v313_v17  ;;  %v1006_v17 = vor.u32 %v1178_v15, %v1005_v14  ;;  %v1007_v18 = vld [vmem:[%s1719_s5 + $0x3c] sm:$0xf0] }
 0x12f   :  { %329 = vadd.xlane.f32.xlu0 %v326_v19  ;;  %537 = vmatpush.bf16.msrb.mxu0 %v1006_v17 }
 0x132   :  { %v314_v20 = vpop.f32.mrf.mxu2 }
 0x133   :  { %v327_v21 = vpop.f32.mrf.mxu3  ;;  %v1179_v20 = vld [vmem:[%s1719_s5 + $0x40] sm:$0xf0]  ;;  %538 = vmatpush.bf16.msrb.mxu0 %v994_v26 }
 0x134   :  { %v1010_v21 = vor.u32 %v1177_v16, %v1007_v18  ;;  %v400_v18 = vperm.slane %v396_v9, 2 }
 0x136   :  { %550 = vmatpush.bf16.msrb.mxu1 %v1010_v21 }
 0x137   :  { %539 = vmatpush.bf16.msrb.mxu0 %v982_v35 }
 0x13a   :  { %551 = vmatpush.bf16.msrb.mxu1 %v998_v30 }
 0x13b   :  { %773 = vmatpush.bf16.msra.mxu0 %v1210_v45 }
 0x13f   :  { %774 = vmatpush.bf16.msra.mxu0 %v1209_v48 }
 0x1a2   :  { %v330_v38 = vpop.xlane.xlu0 %329 }
 0x1a3   :  { %v338_v39 = vmul.f32 %v1497_v37, %v330_v38  ;;  %v989_v38 = vld [vmem:[%s1719_s5 + $0x8] sm:$0xf] }
 0x1a5   :  { %v1500_v40 = vsub.f32 %v326_v19, %v338_v39  ;;  %v1013_v19 = vld [vmem:[%s1719_s5 + $0x38] sm:$0xf]  ;;  %v1173_v39 = vld [vmem:[%s1719_s5 + $0x10] sm:$0xf0] }
 0x1a6   :  { %v1014_v22 = vor.u32 %v1179_v20, %v1013_v19  ;;  %v990_v42 = vor.u32 %v1173_v39, %v989_v38  ;;  %v1219_v39 = vld [vmem:[%s1722_s8 + $0x1] ss:$0 sm:$0xff]  ;;  %s1264_s8 = smov 8  }
 0x1a7   :  { %v340_v41 = vmul.f32 %v1500_v40, %v1500_v40 }
 0x1a8   :  { %563 = vmatpush.bf16.msrb.mxu2 %v1014_v22 }
 0x1a9   :  { %341 = vadd.xlane.f32.xlu0 %v340_v41  ;;  %v986_v41 = vor.u32 %v1171_v34, %v983_v36 }
 0x1ab   :  { %552 = vmatpush.bf16.msrb.mxu1 %v986_v41 }
 0x1ac   :  { %564 = vmatpush.bf16.msrb.mxu2 %v1002_v31 }
 0x1b0   :  { %565 = vmatpush.bf16.msrb.mxu2 %v990_v42 }
 0x21c   :  { %v342_v43 = vpop.xlane.xlu0 %341 }
 0x21d   :  { %v343_v46 = vmul.f32 %v342_v43, %v1497_v37  ;;  %v1208_v37 = vld [vmem:[%s1721_s7 + $0x68] sm:$0xff] }
 0x21e   :  { %775 = vmatpush.bf16.msra.mxu0 %v1208_v37 }
 0x21f   :  { %v344_v49 = vadd.f32 1e-05, %v343_v46 }
 0x221   :  { %1222 = vrsqrt.f32 %v344_v49  ;;  %vm351_vm2 = vweird.f32 %v344_v49 }
 0x222   :  { %776 = vmatpush.bf16.msra.mxu0 %v1207_v52 }
 0x226   :  { %777 = vmatpush.bf16.msra.mxu0 %v1206_v57 }
 0x227   :  { %v1223_v53 = vpop.eup %1222 }
 0x228   :  { %v346_v54 = vmul.f32 %v1223_v53, %v344_v49  ;;  %vm352_vm1 = vweird.f32 %v1223_v53 }
 0x229   :  { %vm353_vm3 = vmor %vm351_vm2, %vm352_vm1 }
 0x22a   :  { %v347_v55 = vmul.f32 %v1223_v53, %v346_v54  ;;  %778 = vmatpush.bf16.msra.mxu0 %v1205_v61 }
 0x22c   :  { %v348_v58 = vmul.f32 0.5, %v347_v55 }
 0x22e   :  { %v349_v59 = vsub.f32 1.5, %v348_v58  ;;  %779 = vmatpush.bf16.msra.mxu0 %v1204_v7 }
 0x230   :  { %v350_v62 = vmul.f32 %v1223_v53, %v349_v59 }
 0x232   :  { %v354_v0 = vsel %vm353_vm3, %v1223_v53, %v350_v62  ;;  %780 = vmatpush.bf16.msra.mxu0 %v1203_v8  ;;  %vm825_vm3 = vcmask 113664  }
 0x233   :  { %v355_v1 = vmul.f32 %v354_v0, %v1500_v40  ;;  %v1195_v40 = vld [vmem:[%s1721_s7] sm:$0xff] }
 0x234   :  { %767 = vmatpush.bf16.msrb.mxu3 %v1195_v40 }
 0x235   :  { %v358_v3 = vmul.f32 %v1216_v63, %v355_v1 }
 0x237   :  { %v361_v4 = vadd.f32 %v1217_v2, %v358_v3 }
 0x239   :  { %v363_v5 = vpack.c.bf16 %v361_v4, %v361_v4  ;;  %362 = vst [vmem:[#allocation3] sm:$0xff] %v361_v4 }
 0x23a   :  { %841 = dma.vmem_to_hbm [thread:$0]  %s837_s19, 128, %s839_s2, [#allocation4]  }
 0x23b   :  { %540 = vmatmul.bf16.vlgmr.msrb.gmra.mxu0 %v363_v5  ;;  %553 = vmatmul.bf16.vlgmr.msrb.gmra.mxu1 %v363_v5 }
 0x23c   :  { %566 = vmatmul.bf16.vlgmr.msrb.gmra.mxu2 %v363_v5 }
 0x2b8   :  { %v541_v12 = vpop.f32.mrf.mxu0  ;;  %v554_v13 = vpop.f32.mrf.mxu1 }
 0x2b9   :  { %v542_v14 = vadd.f32 %v541_v12, %v398_v10  ;;  %v555_v15 = vadd.f32 %v554_v13, %v399_v11  ;;  %v795_v10 = vstv %s1723_s9 }
 0x2bb   :  { %v571_v16 = vmax.f32 %v542_v14, 0.0  ;;  %v572_v17 = vmax.f32 %v555_v15, 0.0 }
 0x2bd   :  { %v628_v19 = vpack.c.bf16 %v571_v16, %v571_v16  ;;  %v629_v20 = vpack.c.bf16 %v572_v17, %v572_v17 }
 0x2bf   :  { %v567_v21 = vpop.f32.mrf.mxu2  ;;  %768 = vmatmul.bf16.vlgmr.msrb.gmra.mxu3 %v628_v19  ;;  %781 = vmatmul.bf16.vlgmr.msra.gmra.mxu0 %v629_v20 }
 0x2c0   :  { %v568_v22 = vadd.f32 %v567_v21, %v400_v18  ;;  %v543_v23 = vpop.f32.mrf.mxu0  ;;  %v556_v24 = vpop.f32.mrf.mxu1 }
 0x2c2   :  { %v599_v25 = vsel %vm598_vm4, %v568_v22, -inf  ;;  %v574_v27 = vsel %vm573_vm5, %v568_v22, -inf  ;;  %vm827_vm4 = vcmask 121856  }
 0x2c3   :  { %600 = vmax.xlane.f32.xlu1 %v599_v25 }
 0x2c7   :  { %v569_v26 = vpop.f32.mrf.mxu2 }
 0x2cb   :  { %575 = vmax.xlane.f32.xlu1 %v574_v27 }
 0x336   :  { %v601_v28 = vpop.xlane.xlu1 %600 }
 0x337   :  { %v602_v29 = vsub.f32 %v568_v22, %v601_v28 }
 0x339   :  { %v603_v30 = vmul.f32 1.442695, %v602_v29 }
 0x33b   :  { %1224 = vpow2.f32 %v603_v30 }
 0x33c   :  { %v782_v31 = vpop.f32.mrf.mxu0 }
 0x33e   :  { %v576_v45 = vpop.xlane.xlu1 %575 }
 0x33f   :  { %v577_v46 = vsub.f32 %v568_v22, %v576_v45 }
 0x341   :  { %v1693_v33 = vpop.eup %1224  ;;  %v578_v47 = vmul.f32 1.442695, %v577_v46 }
 0x342   :  { %606 = vrot.lane.b32.xlu2 %v1693_v33, %s1263_s15  ;;  %v769_v34 = vpop.f32.mrf.mxu3 }
 0x343   :  { %v770_v35 = vadd.f32 %v1218_v32, %v769_v34  ;;  %1226 = vpow2.f32 %v578_v47 }
 0x344   :  { %v784_v36 = vpop.f32.mrf.mxu0 }
 0x345   :  { %v783_v38 = vadd.f32 %v782_v31, %v770_v35 }
 0x347   :  { %v786_v41 = vmax.f32 %v783_v38, 0.0 }
 0x349   :  { %v789_v42 = vmul.f32 %v1219_v39, %v786_v41  ;;  %v1227_v48 = vpop.eup %1226 }
 0x34a   :  { %v771_v43 = vpop.f32.mrf.mxu3  ;;  %v580_v49 = vsel %vm573_vm5, %v1227_v48, 0.0 }
 0x34b   :  { %v791_v44 = vsel %vm790_vm6, %v789_v42, 0.0  ;;  %vm829_vm6 = vcmask 261120  }
 0x34c   :  { %792 = vadd.xlane.f32.xlu1 %v791_v44 }
 0x36b   :  { %581 = vadd.xlane.f32.xlu2 %v580_v49 }
 0x39c   :  { %v607_v50 = vpop.permute.xlu2 %606 }
 0x39d   :  { %v610_v37 = vsel %vm609_vm7, %v607_v50, 0.0 }
 0x39e   :  { %611 = vadd.xlane.f32.xlu0 %v610_v37 }
 0x3bf   :  { %v793_v11 = vpop.xlane.xlu1 %792 }
 0x3c0   :  { %v796_v12 = vadd.f32 %v795_v10, %v793_v11 }
 0x3c2   :  { %v797_v13 = vsub.f32 0.0, %v796_v12 }
 0x3c4   :  { %v798_v14 = vmul.f32 1.442695, %v797_v13 }
 0x3de   :  { %v582_v51 = vpop.xlane.xlu2 %581 }
 0x3df   :  { %1228 = vrcp.f32 %v582_v51  ;;  %v594_v55 = vand.u32 2147483648, %v582_v51  ;;  %v592_v57 = vand.u32 2147483647, %v582_v51  ;;  %vm588_vm9 = vweird.f32 %v582_v51 }
 0x3e1   :  { %v595_v59 = vor.u32 1.1754944e-38, %v594_v55  ;;  %vm593_vm11 = vcmp.eq.f32.partialorder %v592_v57, 8.507059e+37 }
 0x3e5   :  { %v1229_v52 = vpop.eup %1228 }
 0x3e6   :  { %v584_v53 = vmul.f32 %v1229_v52, %v582_v51  ;;  %vm589_vm8 = vweird.f32 %v1229_v52 }
 0x3e7   :  { %vm590_vm10 = vmor %vm588_vm9, %vm589_vm8 }
 0x3e8   :  { %v585_v54 = vsub.f32 1.0, %v584_v53 }
 0x3ea   :  { %v586_v56 = vmul.f32 %v1229_v52, %v585_v54 }
 0x3ec   :  { %v587_v58 = vadd.f32 %v1229_v52, %v586_v56 }
 0x3ee   :  { %v591_v60 = vsel %vm590_vm10, %v1229_v52, %v587_v58 }
 0x3ef   :  { %v596_v61 = vsel %vm593_vm11, %v595_v59, %v591_v60 }
 0x3f0   :  { %v597_v62 = vmul.f32 %v1227_v48, %v596_v61 }
 0x3f2   :  { %821 = vrot.lane.b32.xlu1 %v597_v62, %s1264_s8 }
 0x411   :  { %v612_v63 = vpop.xlane.xlu0 %611 }
 0x412   :  { %1230 = vrcp.f32 %v612_v63  ;;  %v624_v3 = vand.u32 2147483648, %v612_v63  ;;  %v622_v5 = vand.u32 2147483647, %v612_v63  ;;  %vm618_vm13 = vweird.f32 %v612_v63 }
 0x413   :  { %1232 = vpow2.f32 %v798_v14 }
 0x414   :  { %v625_v7 = vor.u32 1.1754944e-38, %v624_v3  ;;  %vm623_vm15 = vcmp.eq.f32.partialorder %v622_v5, 8.507059e+37 }
 0x418   :  { %v1231_v0 = vpop.eup %1230 }
 0x419   :  { %v614_v1 = vmul.f32 %v1231_v0, %v612_v63  ;;  %vm619_vm12 = vweird.f32 %v1231_v0  ;;  %v1233_v15 = vpop.eup %1232 }
 0x41a   :  { %vm620_vm14 = vmor %vm618_vm13, %vm619_vm12  ;;  %v800_v16 = vadd.f32 1.0, %v1233_v15 }
 0x41b   :  { %v615_v2 = vsub.f32 1.0, %v614_v1 }
 0x41c   :  { %1234 = vrcp.f32 %v800_v16  ;;  %v812_v22 = vand.u32 2147483648, %v800_v16  ;;  %vm806_vm1 = vweird.f32 %v800_v16  ;;  %v810_v23 = vand.u32 2147483647, %v800_v16 }
 0x41d   :  { %v616_v4 = vmul.f32 %v1231_v0, %v615_v2 }
 0x41e   :  { %v813_v25 = vor.u32 1.1754944e-38, %v812_v22  ;;  %vm811_vm5 = vcmp.eq.f32.partialorder %v810_v23, 8.507059e+37 }
 0x41f   :  { %v617_v6 = vadd.f32 %v1231_v0, %v616_v4 }
 0x421   :  { %v621_v40 = vsel %vm620_vm14, %v1231_v0, %v617_v6 }
 0x422   :  { %v626_v8 = vsel %vm623_vm15, %v625_v7, %v621_v40  ;;  %v1235_v17 = vpop.eup %1234 }
 0x423   :  { %v627_v9 = vmul.f32 %v1693_v33, %v626_v8  ;;  %v802_v18 = vmul.f32 %v1235_v17, %v800_v16  ;;  %vm807_vm0 = vweird.f32 %v1235_v17 }
 0x424   :  { %vm808_vm2 = vmor %vm806_vm1, %vm807_vm0 }
 0x425   :  { %817 = vrot.lane.b32.xlu0 %v627_v9, %s1263_s15  ;;  %v803_v19 = vsub.f32 1.0, %v802_v18 }
 0x427   :  { %v804_v20 = vmul.f32 %v1235_v17, %v803_v19 }
 0x429   :  { %v805_v21 = vadd.f32 %v1235_v17, %v804_v20 }
 0x42b   :  { %v809_v24 = vsel %vm808_vm2, %v1235_v17, %v805_v21 }
 0x42c   :  { %v814_v28 = vsel %vm811_vm5, %v813_v25, %v809_v24 }
 0x464   :  { %v822_v26 = vpop.permute.xlu1 %821 }
 0x497   :  { %v818_v27 = vpop.permute.xlu0 %817 }
 0x498   :  { %v824_v29 = vsel %vm609_vm7, %v818_v27, %v822_v26 }
 0x499   :  { %v826_v30 = vsel %vm825_vm3, %v824_v29, %v814_v28 }
 0x49a   :  { %v828_v31 = vsel %vm827_vm4, %v826_v30, 0.0 }
 0x49b   :  { %830 = vst.msk [vmem:[%s1725_s11] sm:$0xff] %vm829_vm6, %v828_v31 }
 0x49c   :  { %1260 = dma.done.wait [#allocation4], 128  }
 0x49d   :  { %1261 = vsyncadd [#allocation4], 4294967168 }
 0x49e   :  { %850 = vsyncpa [#allocation4], 1 }

</bundles_post_ra>
